<compile_context>
chip_gen: v7x
topology: tpu7x:2x2x1
jax: 0.10.0
libtpu: 0.0.40
codegen_flags: <defaults>
</compile_context>

<pallas_src>
import functools

import jax
import jax.numpy as jnp
from jax import lax
from jax.experimental import pallas as pl
from jax.experimental.pallas import tpu as pltpu

_LANE = 128
_MAX_BLOCK_ROWS = 1024   # ~512 KiB per f32 input block; sweep 512-2048 if needed
_NUM_SPLITS = 2          # leading 'parallel' axis (both TensorCores on v7x)


def _sums_kernel(x_ref, y_ref, o_ref, acc_i, acc_x, acc_y, *,
                 block_rows, rows, blocks_per_split, full_blocks):
    """Accumulates per-lane partial [intersection, sum_x, sum_y]."""
    c = pl.program_id(0)           # split index ('parallel')
    j = pl.program_id(1)           # row-block index within split ('arbitrary')
    nj = pl.num_programs(1)

    @pl.when(j == 0)
    def _init():
        acc_i[...] = jnp.zeros_like(acc_i)
        acc_x[...] = jnp.zeros_like(acc_x)
        acc_y[...] = jnp.zeros_like(acc_y)

    # Native-dtype DMA, widen to f32 in-vreg.
    sx = jax.nn.sigmoid(x_ref[...].astype(jnp.float32))
    sy = jax.nn.sigmoid(y_ref[...].astype(jnp.float32))

    def _accumulate(a, b):
        acc_i[...] += jnp.sum(a * b, axis=0, keepdims=True)
        acc_x[...] += jnp.sum(a, axis=0, keepdims=True)
        acc_y[...] += jnp.sum(b, axis=0, keepdims=True)

    logical_block = c * blocks_per_split + j

    # Fast path: block lies fully inside the array -> no masking work at all.
    @pl.when(logical_block < full_blocks)
    def _full():
        _accumulate(sx, sy)

    # Slow path: boundary block (partially valid rows) or duplicate block
    # produced by the clamped index_map of the 2-way split -> mask by row.
    @pl.when(logical_block >= full_blocks)
    def _tail():
        row_ids = logical_block * block_rows + lax.broadcasted_iota(
            jnp.int32, (block_rows, _LANE), 0)
        valid = row_ids < rows
        _accumulate(jnp.where(valid, sx, 0.0), jnp.where(valid, sy, 0.0))

    @pl.when(j == nj - 1)
    def _finalize():
        o_ref[0:1, :] = acc_i[...]
        o_ref[1:2, :] = acc_x[...]
        o_ref[2:3, :] = acc_y[...]


def _reduce_sums(x2d, y2d):
    rows = x2d.shape[0]
    block_rows = min(_MAX_BLOCK_ROWS, rows)
    total_blocks = (rows + block_rows - 1) // block_rows
    blocks_per_split = (total_blocks + _NUM_SPLITS - 1) // _NUM_SPLITS
    full_blocks = rows // block_rows   # blocks with every row valid

    kernel = functools.partial(
        _sums_kernel,
        block_rows=block_rows, rows=rows,
        blocks_per_split=blocks_per_split, full_blocks=full_blocks)

    def in_map(c, j):
        # Clamp so duplicate steps of the split re-read a valid block (their
        # contribution is masked out inside the kernel).
        return (jnp.minimum(c * blocks_per_split + j, total_blocks - 1), 0)

    return pl.pallas_call(
        kernel,
        out_shape=jax.ShapeDtypeStruct((_NUM_SPLITS, 3, _LANE), jnp.float32),
        grid_spec=pltpu.PrefetchScalarGridSpec(
            num_scalar_prefetch=0,
            grid=(_NUM_SPLITS, blocks_per_split),
            in_specs=[
                pl.BlockSpec((block_rows, _LANE), in_map),
                pl.BlockSpec((block_rows, _LANE), in_map),
            ],
            out_specs=pl.BlockSpec((None, 3, _LANE), lambda c, j: (c, 0, 0)),
            scratch_shapes=[pltpu.VMEM((1, _LANE), jnp.float32)] * 3,
        ),
        compiler_params=pltpu.CompilerParams(
            dimension_semantics=("parallel", "arbitrary")),
    )(x2d, y2d)


def maxoverlap_loss(inputs, targets, smooth=1.0, n_classes=None):
    """Pallas implementation of MaxoverlapLoss.forward (n_classes unused)."""
    del n_classes
    x = inputs.reshape(-1)
    y = targets.reshape(-1)
    n = x.shape[0]

    # Only the ragged lane tail (< 128 elems) is padded; sigmoid(pad) == 0.
    # For lane-aligned inputs (the common case) this is a no-op: no copy.
    pad = (-n) % _LANE
    if pad:
        x = jnp.concatenate([x, jnp.full((pad,), -1e30, x.dtype)])
        y = jnp.concatenate([y, jnp.full((pad,), -1e30, y.dtype)])

    rows = (n + pad) // _LANE
    x2d = x.reshape(rows, _LANE)
    y2d = y.reshape(rows, _LANE)

    partial = _reduce_sums(x2d, y2d)          # (_NUM_SPLITS, 3, 128)
    sums = jnp.sum(partial, axis=(0, 2))      # (3,) cheap final scalarization
    intersection, sum_x, sum_y = sums[0], sums[1], sums[2]

    ratio_1 = (intersection + smooth) / (sum_x + smooth)
    ratio_2 = (intersection + smooth) / (sum_y + smooth)
    return 2.0 - ratio_1 - ratio_2


def _reference(inputs, targets, smooth=1.0):
    yt = jax.nn.sigmoid(inputs.reshape(-1).astype(jnp.float32))
    yp = jax.nn.sigmoid(targets.reshape(-1).astype(jnp.float32))
    inter = jnp.sum(yt * yp)
    return (2.0 - (inter + smooth) / (jnp.sum(yt) + smooth)
            - (inter + smooth) / (jnp.sum(yp) + smooth))


if __name__ == "__main__":
    key = jax.random.PRNGKey(0)
    k1, k2, k3, k4 = jax.random.split(key, 4)

    # Segmentation-style loss inputs: batch=2, channels=4, spatial 16x16.
    inputs = jax.random.normal(k1, (2, 4, 16, 16), dtype=jnp.float32)
    targets = jax.random.normal(k2, (2, 4, 16, 16), dtype=jnp.float32)

    loss = jax.jit(maxoverlap_loss)(inputs, targets)
    loss = jax.block_until_ready(loss)
    ref = _reference(inputs, targets)
    assert jnp.allclose(loss, ref, rtol=1e-5, atol=1e-5), (loss, ref)

    # Non-lane-aligned shape to exercise the tail padding + masking path.
    inputs2 = jax.random.normal(k3, (2, 3, 5, 7), dtype=jnp.float32)
    targets2 = jax.random.normal(k4, (2, 3, 5, 7), dtype=jnp.float32)
    loss2 = jax.block_until_ready(jax.jit(maxoverlap_loss)(inputs2, targets2))
    ref2 = _reference(inputs2, targets2)
    assert jnp.allclose(loss2, ref2, rtol=1e-5, atol=1e-5), (loss2, ref2)

    print("KERNEL_OK")
</pallas_src>

<mosaic_0001>
module attributes {stable_mosaic.version = 11 : i64} {
  func.func @_sums_kernel(%arg0: i32, %arg1: i32, %arg2: memref<16x128xf32, #tpu.memory_space<vmem>>, %arg3: memref<16x128xf32, #tpu.memory_space<vmem>>, %arg4: memref<1x3x128xf32, #tpu.memory_space<vmem>>, %arg5: memref<1x128xf32, #tpu.memory_space<vmem>>, %arg6: memref<1x128xf32, #tpu.memory_space<vmem>>, %arg7: memref<1x128xf32, #tpu.memory_space<vmem>>) attributes {dimension_semantics = [#tpu.dimension_semantics<parallel>, #tpu.dimension_semantics<arbitrary>], iteration_bounds = array<i64: 2, 1>, scalar_prefetch = 0 : i64, scratch_operands = 3 : i64, tpu.core_type = #tpu.core_type<tc>, window_params = [{transform_indices = @transform_0, window_bounds = array<i64: 16, 128>}, {transform_indices = @transform_1, window_bounds = array<i64: 16, 128>}, {transform_indices = @transform_2, window_bounds = array<i64: 1, 3, 128>}]} {
    %c0_i32 = arith.constant 0 : i32
    %0 = arith.cmpi eq, %arg1, %c0_i32 : i32
    %1 = arith.extui %0 : i1 to i32
    %c0_i32_0 = arith.constant 0 : i32
    %2 = arith.cmpi ne, %1, %c0_i32_0 : i32
    scf.if %2 {
      %cst_11 = arith.constant 0.000000e+00 : f32
      %26 = vector.broadcast %cst_11 : f32 to vector<1x128xf32>
      %c0_12 = arith.constant 0 : index
      %c0_13 = arith.constant 0 : index
      %27 = vector.load %arg5[%c0_12, %c0_13] : memref<1x128xf32, #tpu.memory_space<vmem>>, vector<1x128xf32>
      tpu.vector_store %arg5[%c0_12, %c0_13], %26 {strides = array<i32>} : memref<1x128xf32, #tpu.memory_space<vmem>>, vector<1x128xf32>,
      %cst_14 = arith.constant 0.000000e+00 : f32
      %28 = vector.broadcast %cst_14 : f32 to vector<1x128xf32>
      %c0_15 = arith.constant 0 : index
      %c0_16 = arith.constant 0 : index
      %29 = vector.load %arg6[%c0_15, %c0_16] : memref<1x128xf32, #tpu.memory_space<vmem>>, vector<1x128xf32>
      tpu.vector_store %arg6[%c0_15, %c0_16], %28 {strides = array<i32>} : memref<1x128xf32, #tpu.memory_space<vmem>>, vector<1x128xf32>,
      %cst_17 = arith.constant 0.000000e+00 : f32
      %30 = vector.broadcast %cst_17 : f32 to vector<1x128xf32>
      %c0_18 = arith.constant 0 : index
      %c0_19 = arith.constant 0 : index
      %31 = vector.load %arg7[%c0_18, %c0_19] : memref<1x128xf32, #tpu.memory_space<vmem>>, vector<1x128xf32>
      tpu.vector_store %arg7[%c0_18, %c0_19], %30 {strides = array<i32>} : memref<1x128xf32, #tpu.memory_space<vmem>>, vector<1x128xf32>,
    } else {
    }
    %c0 = arith.constant 0 : index
    %c0_1 = arith.constant 0 : index
    %3 = vector.load %arg2[%c0, %c0_1] : memref<16x128xf32, #tpu.memory_space<vmem>>, vector<16x128xf32>
    %4 = arith.negf %3 : vector<16x128xf32>
    %5 = math.exp %4 : vector<16x128xf32>
    %cst = arith.constant 1.000000e+00 : f32
    %6 = vector.broadcast %cst : f32 to vector<16x128xf32>
    %7 = arith.addf %6, %5 : vector<16x128xf32>
    %8 = arith.divf %6, %7 : vector<16x128xf32>
    %c0_2 = arith.constant 0 : index
    %c0_3 = arith.constant 0 : index
    %9 = vector.load %arg3[%c0_2, %c0_3] : memref<16x128xf32, #tpu.memory_space<vmem>>, vector<16x128xf32>
    %10 = arith.negf %9 : vector<16x128xf32>
    %11 = math.exp %10 : vector<16x128xf32>
    %cst_4 = arith.constant 1.000000e+00 : f32
    %12 = vector.broadcast %cst_4 : f32 to vector<16x128xf32>
    %13 = arith.addf %12, %11 : vector<16x128xf32>
    %14 = arith.divf %12, %13 : vector<16x128xf32>
    %c1_i32 = arith.constant 1 : i32
    %15 = arith.muli %arg0, %c1_i32 : i32
    %16 = arith.addi %15, %arg1 : i32
    %c1_i32_5 = arith.constant 1 : i32
    %17 = arith.cmpi slt, %16, %c1_i32_5 : i32
    %18 = arith.extui %17 : i1 to i32
    %c0_i32_6 = arith.constant 0 : i32
    %19 = arith.cmpi ne, %18, %c0_i32_6 : i32
    scf.if %19 {
      %c0_11 = arith.constant 0 : index
      %c0_12 = arith.constant 0 : index
      %26 = vector.load %arg5[%c0_11, %c0_12] : memref<1x128xf32, #tpu.memory_space<vmem>>, vector<1x128xf32>
      %27 = arith.mulf %8, %14 : vector<16x128xf32>
      %cst_13 = arith.constant dense<0.000000e+00> : vector<128xf32>
      %28 = vector.multi_reduction <add>, %27, %cst_13 [0] : vector<16x128xf32> to vector<128xf32>
      %29 = vector.shape_cast %28 : vector<128xf32> to vector<1x128xf32>
      %30 = arith.addf %26, %29 : vector<1x128xf32>
      %c0_14 = arith.constant 0 : index
      %c0_15 = arith.constant 0 : index
      %31 = vector.load %arg5[%c0_14, %c0_15] : memref<1x128xf32, #tpu.memory_space<vmem>>, vector<1x128xf32>
      tpu.vector_store %arg5[%c0_14, %c0_15], %30 {strides = array<i32>} : memref<1x128xf32, #tpu.memory_space<vmem>>, vector<1x128xf32>,
      %c0_16 = arith.constant 0 : index
      %c0_17 = arith.constant 0 : index
      %32 = vector.load %arg6[%c0_16, %c0_17] : memref<1x128xf32, #tpu.memory_space<vmem>>, vector<1x128xf32>
      %cst_18 = arith.constant dense<0.000000e+00> : vector<128xf32>
      %33 = vector.multi_reduction <add>, %8, %cst_18 [0] : vector<16x128xf32> to vector<128xf32>
      %34 = vector.shape_cast %33 : vector<128xf32> to vector<1x128xf32>
      %35 = arith.addf %32, %34 : vector<1x128xf32>
      %c0_19 = arith.constant 0 : index
      %c0_20 = arith.constant 0 : index
      %36 = vector.load %arg6[%c0_19, %c0_20] : memref<1x128xf32, #tpu.memory_space<vmem>>, vector<1x128xf32>
      tpu.vector_store %arg6[%c0_19, %c0_20], %35 {strides = array<i32>} : memref<1x128xf32, #tpu.memory_space<vmem>>, vector<1x128xf32>,
      %c0_21 = arith.constant 0 : index
      %c0_22 = arith.constant 0 : index
      %37 = vector.load %arg7[%c0_21, %c0_22] : memref<1x128xf32, #tpu.memory_space<vmem>>, vector<1x128xf32>
      %cst_23 = arith.constant dense<0.000000e+00> : vector<128xf32>
      %38 = vector.multi_reduction <add>, %14, %cst_23 [0] : vector<16x128xf32> to vector<128xf32>
      %39 = vector.shape_cast %38 : vector<128xf32> to vector<1x128xf32>
      %40 = arith.addf %37, %39 : vector<1x128xf32>
      %c0_24 = arith.constant 0 : index
      %c0_25 = arith.constant 0 : index
      %41 = vector.load %arg7[%c0_24, %c0_25] : memref<1x128xf32, #tpu.memory_space<vmem>>, vector<1x128xf32>
      tpu.vector_store %arg7[%c0_24, %c0_25], %40 {strides = array<i32>} : memref<1x128xf32, #tpu.memory_space<vmem>>, vector<1x128xf32>,
    } else {
    }
    %c1_i32_7 = arith.constant 1 : i32
    %20 = arith.cmpi sge, %16, %c1_i32_7 : i32
    %21 = arith.extui %20 : i1 to i32
    %c0_i32_8 = arith.constant 0 : i32
    %22 = arith.cmpi ne, %21, %c0_i32_8 : i32
    scf.if %22 {
      %c16_i32 = arith.constant 16 : i32
      %26 = arith.muli %16, %c16_i32 : i32
      %27 = tpu.iota {dimensions = array<i32: 0>} : vector<16x128xi32>
      %28 = vector.broadcast %26 : i32 to vector<16x128xi32>
      %29 = arith.addi %28, %27 : vector<16x128xi32>
      %c16_i32_11 = arith.constant 16 : i32
      %30 = vector.broadcast %c16_i32_11 : i32 to vector<16x128xi32>
      %31 = arith.cmpi slt, %29, %30 : vector<16x128xi32>
      %cst_12 = arith.constant 0.000000e+00 : f32
      %32 = vector.broadcast %cst_12 : f32 to vector<16x128xf32>
      %33 = arith.select %31, %8, %32 : vector<16x128xi1>, vector<16x128xf32>
      %cst_13 = arith.constant 0.000000e+00 : f32
      %34 = vector.broadcast %cst_13 : f32 to vector<16x128xf32>
      %35 = arith.select %31, %14, %34 : vector<16x128xi1>, vector<16x128xf32>
      %c0_14 = arith.constant 0 : index
      %c0_15 = arith.constant 0 : index
      %36 = vector.load %arg5[%c0_14, %c0_15] : memref<1x128xf32, #tpu.memory_space<vmem>>, vector<1x128xf32>
      %37 = arith.mulf %33, %35 : vector<16x128xf32>
      %cst_16 = arith.constant dense<0.000000e+00> : vector<128xf32>
      %38 = vector.multi_reduction <add>, %37, %cst_16 [0] : vector<16x128xf32> to vector<128xf32>
      %39 = vector.shape_cast %38 : vector<128xf32> to vector<1x128xf32>
      %40 = arith.addf %36, %39 : vector<1x128xf32>
      %c0_17 = arith.constant 0 : index
      %c0_18 = arith.constant 0 : index
      %41 = vector.load %arg5[%c0_17, %c0_18] : memref<1x128xf32, #tpu.memory_space<vmem>>, vector<1x128xf32>
      tpu.vector_store %arg5[%c0_17, %c0_18], %40 {strides = array<i32>} : memref<1x128xf32, #tpu.memory_space<vmem>>, vector<1x128xf32>,
      %c0_19 = arith.constant 0 : index
      %c0_20 = arith.constant 0 : index
      %42 = vector.load %arg6[%c0_19, %c0_20] : memref<1x128xf32, #tpu.memory_space<vmem>>, vector<1x128xf32>
      %cst_21 = arith.constant dense<0.000000e+00> : vector<128xf32>
      %43 = vector.multi_reduction <add>, %33, %cst_21 [0] : vector<16x128xf32> to vector<128xf32>
      %44 = vector.shape_cast %43 : vector<128xf32> to vector<1x128xf32>
      %45 = arith.addf %42, %44 : vector<1x128xf32>
      %c0_22 = arith.constant 0 : index
      %c0_23 = arith.constant 0 : index
      %46 = vector.load %arg6[%c0_22, %c0_23] : memref<1x128xf32, #tpu.memory_space<vmem>>, vector<1x128xf32>
      tpu.vector_store %arg6[%c0_22, %c0_23], %45 {strides = array<i32>} : memref<1x128xf32, #tpu.memory_space<vmem>>, vector<1x128xf32>,
      %c0_24 = arith.constant 0 : index
      %c0_25 = arith.constant 0 : index
      %47 = vector.load %arg7[%c0_24, %c0_25] : memref<1x128xf32, #tpu.memory_space<vmem>>, vector<1x128xf32>
      %cst_26 = arith.constant dense<0.000000e+00> : vector<128xf32>
      %48 = vector.multi_reduction <add>, %35, %cst_26 [0] : vector<16x128xf32> to vector<128xf32>
      %49 = vector.shape_cast %48 : vector<128xf32> to vector<1x128xf32>
      %50 = arith.addf %47, %49 : vector<1x128xf32>
      %c0_27 = arith.constant 0 : index
      %c0_28 = arith.constant 0 : index
      %51 = vector.load %arg7[%c0_27, %c0_28] : memref<1x128xf32, #tpu.memory_space<vmem>>, vector<1x128xf32>
      tpu.vector_store %arg7[%c0_27, %c0_28], %50 {strides = array<i32>} : memref<1x128xf32, #tpu.memory_space<vmem>>, vector<1x128xf32>,
    } else {
    }
    %c0_i32_9 = arith.constant 0 : i32
    %23 = arith.cmpi eq, %arg1, %c0_i32_9 : i32
    %24 = arith.extui %23 : i1 to i32
    %c0_i32_10 = arith.constant 0 : i32
    %25 = arith.cmpi ne, %24, %c0_i32_10 : i32
    scf.if %25 {
      %c0_11 = arith.constant 0 : index
      %c0_12 = arith.constant 0 : index
      %26 = vector.load %arg5[%c0_11, %c0_12] : memref<1x128xf32, #tpu.memory_space<vmem>>, vector<1x128xf32>
      %c0_13 = arith.constant 0 : index
      %c0_14 = arith.constant 0 : index
      %c0_15 = arith.constant 0 : index
      %27 = vector.load %arg4[%c0_13, %c0_14, %c0_15] : memref<1x3x128xf32, #tpu.memory_space<vmem>>, vector<1x1x128xf32>
      %28 = vector.shape_cast %27 : vector<1x1x128xf32> to vector<1x128xf32>
      %29 = vector.shape_cast %26 : vector<1x128xf32> to vector<1x1x128xf32>
      tpu.vector_store %arg4[%c0_13, %c0_14, %c0_15], %29 {strides = array<i32>} : memref<1x3x128xf32, #tpu.memory_space<vmem>>, vector<1x1x128xf32>,
      %c0_16 = arith.constant 0 : index
      %c0_17 = arith.constant 0 : index
      %30 = vector.load %arg6[%c0_16, %c0_17] : memref<1x128xf32, #tpu.memory_space<vmem>>, vector<1x128xf32>
      %c0_18 = arith.constant 0 : index
      %c1 = arith.constant 1 : index
      %c0_19 = arith.constant 0 : index
      %31 = vector.load %arg4[%c0_18, %c1, %c0_19] : memref<1x3x128xf32, #tpu.memory_space<vmem>>, vector<1x1x128xf32>
      %32 = vector.shape_cast %31 : vector<1x1x128xf32> to vector<1x128xf32>
      %33 = vector.shape_cast %30 : vector<1x128xf32> to vector<1x1x128xf32>
      tpu.vector_store %arg4[%c0_18, %c1, %c0_19], %33 {strides = array<i32>} : memref<1x3x128xf32, #tpu.memory_space<vmem>>, vector<1x1x128xf32>,
      %c0_20 = arith.constant 0 : index
      %c0_21 = arith.constant 0 : index
      %34 = vector.load %arg7[%c0_20, %c0_21] : memref<1x128xf32, #tpu.memory_space<vmem>>, vector<1x128xf32>
      %c0_22 = arith.constant 0 : index
      %c2 = arith.constant 2 : index
      %c0_23 = arith.constant 0 : index
      %35 = vector.load %arg4[%c0_22, %c2, %c0_23] : memref<1x3x128xf32, #tpu.memory_space<vmem>>, vector<1x1x128xf32>
      %36 = vector.shape_cast %35 : vector<1x1x128xf32> to vector<1x128xf32>
      %37 = vector.shape_cast %34 : vector<1x128xf32> to vector<1x1x128xf32>
      tpu.vector_store %arg4[%c0_22, %c2, %c0_23], %37 {strides = array<i32>} : memref<1x3x128xf32, #tpu.memory_space<vmem>>, vector<1x1x128xf32>,
    } else {
    }
    return
  }
  func.func @transform_0(%arg0: i32, %arg1: i32) -> (i32, i32) {
    %c1_i32 = arith.constant 1 : i32
    %0 = arith.muli %arg0, %c1_i32 : i32
    %1 = arith.addi %0, %arg1 : i32
    %c0_i32 = arith.constant 0 : i32
    %2 = arith.minsi %1, %c0_i32 : i32
    %c0_i32_0 = arith.constant 0 : i32
    %c0_i32_1 = arith.constant 0 : i32
    return %2, %c0_i32_0 : i32, i32
  }
  func.func @transform_1(%arg0: i32, %arg1: i32) -> (i32, i32) {
    %c1_i32 = arith.constant 1 : i32
    %0 = arith.muli %arg0, %c1_i32 : i32
    %1 = arith.addi %0, %arg1 : i32
    %c0_i32 = arith.constant 0 : i32
    %2 = arith.minsi %1, %c0_i32 : i32
    %c0_i32_0 = arith.constant 0 : i32
    %c0_i32_1 = arith.constant 0 : i32
    return %2, %c0_i32_0 : i32, i32
  }
  func.func @transform_2(%arg0: i32, %arg1: i32) -> (i32, i32, i32) {
    %c0_i32 = arith.constant 0 : i32
    %c0_i32_0 = arith.constant 0 : i32
    %c0_i32_1 = arith.constant 0 : i32
    return %arg0, %c0_i32, %c0_i32_0 : i32, i32, i32
  }
}

</mosaic_0001>

<bundles_post_ra>
// kernel: maxoverlap_loss.1
= control target key start
LH: loop header
LB: loop body
LE: loop exit
PB: predicated region body
PF: predicated region fallthrough
CT: control target
= control target key end

     0   :  { %s523_s9 = smov 0   ;;  %s525_s10 = smov 0   ;;  %s576_s0 = inlined_call_operand.vmem [shape: f32[16,128], index: 0, kind: input, shape index: {}]   ;;  %s577_s1 = inlined_call_operand.vmem [shape: f32[16,128], index: 1, kind: input, shape index: {}]   ;;  %s578_s2 = inlined_call_operand.vmem [shape: f32[2,3,128], index: 2, kind: output, shape index: {}]  }
   0x1   :  { %s527_s11 = smov 0  }
   0x2 LB: > { %s24_s12 = sadd.s32 1, %s501_s10  ;;  %p427_p0 = scmp.ge.s32.totalorder %s505_s11, 1  ;;  %s505_s11 = sphi %s527_s11, %s12_s11   ;;  %s501_s10 = sphi %s525_s10, %s580_s10   ;;  %s497_s9 = sphi %s523_s9, %s579_s9  }
   0x3   : > { %p26_p1 = scmp.ge.s32.totalorder %s24_s12, 2  ;;  %p160_p2 = scmp.lt.s32.totalorder %s505_s11, 3 }
   0x5   : > { %s582_s12 = smov (%p26_p1, %s24_s12), 0  ;;  %p161_p3 = pnand %p427_p0, %p160_p2 }
   0x6   : > { %p193_p4 = scmp.lt.s32.totalorder (!%p161_p3), %s497_s9, 0  ;;  %p216_p5 = scmp.lt.s32.totalorder (!%p161_p3), %s497_s9, 1  ;;  %v507_v0 = vmov (!%p161_p3), 0.0  }
   0x7   : > { %164 = sbr.rel (%p161_p3) target bundleno = 108 (0x6c), region = 28  ;;  %224 = vst [vmem:[#allocation2] sm:$0x1] (!%p161_p3), %v507_v0  ;;  %225 = vst [vmem:[#allocation3] sm:$0x1] (!%p161_p3), %v507_v0  ;;  %p437_p7 = scmp.ge.s32.totalorder (!%p161_p3), %s497_s9, 1 }
   0x8   : > { %226 = vst [vmem:[#allocation4] sm:$0x1] (!%p161_p3), %v507_v0 }
   0xe   : > { %s194_s13 = scalar_select %p193_p4, %s497_s9, 0 }
   0xf   : > { %s217_s14 = scalar_select %p216_p5, %s497_s9, 1 }
  0x10   : > { %s428_s15 = sshll.u32 %s194_s13, 1  ;;  %v272_v40 = vld [vmem:[#allocation3] sm:$0x1] (!%p437_p7)  ;;  %v282_v41 = vld [vmem:[#allocation4] sm:$0x1] (!%p437_p7) }
  0x11   : > { %p196_p6 = scmp.lt.s32.totalorder %s428_s15, 1  ;;  %s432_s16 = sshll.u32 %s217_s14, 2  ;;  %v260_v45 = vld [vmem:[#allocation2] sm:$0x1] (!%p437_p7) }
  0x12   : > { %s552_s19 = scalar_lea.vmem %s578_s2, %s432_s16 }
  0x13   : > { %s584_s15 = smov (!%p196_p6, %s428_s15), 1 }
  0x14   : > { %s429_s20 = sshll.u32 %s584_s15, 3 }
  0x15   : > { %s199_s23 = scalar_lea.vmem %s576_s0, %s429_s20  ;;  %s211_s26 = scalar_lea.vmem %s577_s1, %s429_s20 }
  0x16   : > { %v227_v1 = vld [vmem:[%s199_s23] sm:$0xff]  ;;  %v228_v2 = vld [vmem:[%s199_s23 + $0x8] sm:$0xff] }
  0x17   : > { %v241_v3 = vld [vmem:[%s211_s26] sm:$0xff]  ;;  %v433_v4 = vmul.f32 -1.442695, %v227_v1  ;;  %v434_v5 = vmul.f32 -1.442695, %v228_v2  ;;  %v242_v6 = vld [vmem:[%s211_s26 + $0x8] sm:$0xff] }
  0x18   : > { %v435_v7 = vmul.f32 -1.442695, %v241_v3  ;;  %v436_v8 = vmul.f32 -1.442695, %v242_v6 }
  0x19   : > { %467 = vpow2.f32 %v433_v4 }
  0x1a   : > { %469 = vpow2.f32 %v434_v5 }
  0x1b   : > { %471 = vpow2.f32 %v435_v7 }
  0x1c   : > { %473 = vpow2.f32 %v436_v8 }
  0x23   : > { %v468_v9 = vpop.eup %467 }
  0x24   : > { %v470_v10 = vpop.eup %469  ;;  %v235_v11 = vadd.f32 1.0, %v468_v9 }
  0x25   : > { %v472_v12 = vpop.eup %471  ;;  %v236_v13 = vadd.f32 1.0, %v470_v10 }
  0x26   : > { %v474_v14 = vpop.eup %473  ;;  %475 = vrcp.f32 %v235_v11  ;;  %v249_v15 = vadd.f32 1.0, %v472_v12 }
  0x27   : > { %477 = vrcp.f32 %v236_v13  ;;  %v250_v16 = vadd.f32 1.0, %v474_v14 }
  0x28   : > { %479 = vrcp.f32 %v249_v15 }
  0x29   : > { %481 = vrcp.f32 %v250_v16 }
  0x2d   : > { %259 = sbr.rel (%p437_p7) target bundleno = 71 (0x47), region = 36 }
  0x30   : > { %v476_v17 = vpop.eup %475 }
  0x31   : > { %v478_v18 = vpop.eup %477 }
  0x32   : > { %v480_v19 = vpop.eup %479  ;;  %v273_v23 = vadd.f32 (!%p437_p7), %v478_v18, %v476_v17 }
  0x33   : > { %v482_v20 = vpop.eup %481  ;;  %v261_v21 = vmul.f32 (!%p437_p7), %v480_v19, %v476_v17 }
  0x34   : > { %v262_v22 = vmul.f32 %v482_v20, %v478_v18  ;;  %v283_v24 = vadd.f32 %v482_v20, %v480_v19  ;;  %v274_v26 = vrot.slane %v273_v23, 4 }
  0x36   : > { %v263_v25 = vadd.f32 %v262_v22, %v261_v21  ;;  %v284_v27 = vrot.slane %v283_v24, 4  ;;  %v275_v29 = vadd.f32 %v274_v26, %v273_v23 }
  0x38   : > { %v264_v28 = vrot.slane %v263_v25, 4  ;;  %v285_v30 = vadd.f32 %v284_v27, %v283_v24  ;;  %v276_v32 = vrot.slane %v275_v29, 2 }
  0x3a   : > { %v265_v31 = vadd.f32 %v264_v28, %v263_v25  ;;  %v286_v33 = vrot.slane %v285_v30, 2  ;;  %v277_v35 = vadd.f32 %v276_v32, %v275_v29 }
  0x3c   : > { %v266_v34 = vrot.slane %v265_v31, 2  ;;  %v287_v36 = vadd.f32 %v286_v33, %v285_v30  ;;  %v278_v38 = vrot.slane %v277_v35, 1 }
  0x3e   : > { %v267_v37 = vadd.f32 %v266_v34, %v265_v31  ;;  %v288_v39 = vrot.slane %v287_v36, 1  ;;  %v279_v43 = vadd.f32 %v278_v38, %v277_v35 }
  0x40   : > { %v268_v42 = vrot.slane %v267_v37, 1  ;;  %v289_v44 = vadd.f32 %v288_v39, %v287_v36  ;;  %v280_v47 = vadd.f32 %v279_v43, %v272_v40 }
  0x42   : > { %v269_v46 = vadd.f32 %v268_v42, %v267_v37  ;;  %v290_v48 = vadd.f32 %v289_v44, %v282_v41  ;;  %281 = vst [vmem:[#allocation3] sm:$0x1] %v280_v47 }
  0x44   : > { %v270_v49 = vadd.f32 %v269_v46, %v260_v45  ;;  %291 = vst [vmem:[#allocation4] sm:$0x1] %v290_v48 }
  0x46   : > { %271 = vst [vmem:[#allocation2] sm:$0x1] %v270_v49 }
  0x47 PF: > { %295 = sbr.rel (%p216_p5) target bundleno = 100 (0x64), region = 40  ;;  %s439_s27 = sshll.u32 (!%p216_p5), %s497_s9, 4  ;;  %v297_v50 = vlaneseq (!%p216_p5) }
  0x48   : > { %v300_v51 = vstv (!%p216_p5), %s439_s27 }
  0x49   : > { %v298_v52 = vshrl.u32 (!%p216_p5), %v297_v50, 7  ;;  %v321_v15 = vld [vmem:[#allocation3] sm:$0x1] (!%p216_p5) }
  0x4b   : > { %v299_v53 = vadd.s32 (!%p216_p5), 8, %v298_v52  ;;  %v301_v54 = vadd.s32 (!%p216_p5), %v300_v51, %v298_v52  ;;  %v331_v16 = vld [vmem:[#allocation4] sm:$0x1] (!%p216_p5) }
  0x4d   : > { %v302_v55 = vadd.s32 (!%p216_p5), %v300_v51, %v299_v53  ;;  %vm303_vm0 = vcmp.lt.s32.totalorder (!%p216_p5), %v301_v54, 16 }
  0x4e   : > { %v305_v56 = vsel %vm303_vm0, %v476_v17, 0.0  ;;  %v307_v57 = vsel %vm303_vm0, %v480_v19, 0.0 }
  0x4f   : > { %vm304_vm1 = vcmp.lt.s32.totalorder %v302_v55, 16  ;;  %v310_v58 = vmul.f32 %v307_v57, %v305_v56 }
  0x50   : > { %v306_v59 = vsel %vm304_vm1, %v478_v18, 0.0  ;;  %v308_v60 = vsel %vm304_vm1, %v482_v20, 0.0  ;;  %v309_v20 = vld [vmem:[#allocation2] sm:$0x1] }
  0x51   : > { %v311_v61 = vmul.f32 %v308_v60, %v306_v59  ;;  %v322_v62 = vadd.f32 %v306_v59, %v305_v56  ;;  %v332_v63 = vadd.f32 %v308_v60, %v307_v57 }
  0x53   : > { %v312_v0 = vadd.f32 %v311_v61, %v310_v58  ;;  %v323_v1 = vrot.slane %v322_v62, 4  ;;  %v333_v2 = vrot.slane %v332_v63, 4 }
  0x55   : > { %v313_v3 = vrot.slane %v312_v0, 4  ;;  %v324_v4 = vadd.f32 %v323_v1, %v322_v62  ;;  %v334_v5 = vadd.f32 %v333_v2, %v332_v63 }
  0x57   : > { %v314_v6 = vadd.f32 %v313_v3, %v312_v0  ;;  %v325_v7 = vrot.slane %v324_v4, 2  ;;  %v335_v8 = vrot.slane %v334_v5, 2 }
  0x59   : > { %v315_v9 = vrot.slane %v314_v6, 2  ;;  %v326_v10 = vadd.f32 %v325_v7, %v324_v4  ;;  %v336_v11 = vadd.f32 %v335_v8, %v334_v5 }
  0x5b   : > { %v316_v12 = vadd.f32 %v315_v9, %v314_v6  ;;  %v327_v13 = vrot.slane %v326_v10, 1  ;;  %v337_v14 = vrot.slane %v336_v11, 1 }
  0x5d   : > { %v317_v17 = vrot.slane %v316_v12, 1  ;;  %v328_v18 = vadd.f32 %v327_v13, %v326_v10  ;;  %v338_v19 = vadd.f32 %v337_v14, %v336_v11 }
  0x5f   : > { %v318_v21 = vadd.f32 %v317_v17, %v316_v12  ;;  %v329_v22 = vadd.f32 %v328_v18, %v321_v15  ;;  %v339_v23 = vadd.f32 %v338_v19, %v331_v16 }
  0x61   : > { %v319_v24 = vadd.f32 %v318_v21, %v309_v20  ;;  %330 = vst [vmem:[#allocation3] sm:$0x1] %v329_v22  ;;  %340 = vst [vmem:[#allocation4] sm:$0x1] %v339_v23 }
  0x63   : > { %320 = vst [vmem:[#allocation2] sm:$0x1] %v319_v24 }
  0x64 PF:  {}
  0x68   : > { %v346_v26 = vld [vmem:[#allocation3] sm:$0x1]  ;;  %v348_v27 = vld [vmem:[#allocation4] sm:$0x1] }
  0x69   : > { %347 = vst [vmem:[%s552_s19 + $0x1] sm:$0x1] %v346_v26  ;;  %349 = vst [vmem:[%s552_s19 + $0x2] sm:$0x1] %v348_v27 }
  0x6a   : > { %v344_v25 = vld [vmem:[#allocation2] sm:$0x1] }
  0x6b   : > { %345 = vst [vmem:[%s552_s19] sm:$0x1] %v344_v25 }
  0x6c PF: > { %s12_s11 = sadd.s32 1, %s505_s11   ;;  %s579_s9 = smov %s501_s10 }
  0x6d   : > { %p9_p8 = scmp.ge.s32.totalorder %s12_s11, 4   ;;  %s580_s10 = smov %s582_s12 }
  0x6f   :  { %11 = sbr.rel (!%p9_p8) target bundleno = 2 (0x2), region = 77 }

</bundles_post_ra>
